<compile_context>
chip_gen: v6e
topology: v6e:2x2x1
jax: 0.10.0
libtpu: 0.0.40
codegen_flags: <defaults>
</compile_context>

<pallas_src>
import functools

import jax
import jax.numpy as jnp
from jax.experimental import pallas as pl
from jax.experimental.pallas import tpu as pltpu


# ----------------------------------------------------------------------------
# Pallas kernels: out = act(x @ w + b), f32 accumulation on the MXU.
# ----------------------------------------------------------------------------
def _matmul_bias_act_single_k(x_ref, w_ref, b_ref, o_ref, *, apply_relu):
    # Whole reduction in one block: no scratch, no predicated regions.
    out = jnp.dot(x_ref[...], w_ref[...],
                  preferred_element_type=jnp.float32) + b_ref[...]
    if apply_relu:
        out = jnp.maximum(out, 0.0)
    o_ref[...] = out.astype(o_ref.dtype)


def _matmul_bias_act_multi_k(x_ref, w_ref, b_ref, o_ref, acc_ref, *, apply_relu):
    @pl.when(pl.program_id(2) == 0)
    def _():
        # Bias-initialized accumulator (saves an epilogue VALU add).
        acc_ref[...] = jnp.broadcast_to(b_ref[...], acc_ref.shape)

    acc_ref[...] += jnp.dot(x_ref[...], w_ref[...],
                            preferred_element_type=jnp.float32)

    @pl.when(pl.program_id(2) == pl.num_programs(2) - 1)
    def _():
        out = acc_ref[...]
        if apply_relu:
            out = jnp.maximum(out, 0.0)
        o_ref[...] = out.astype(o_ref.dtype)


# ----------------------------------------------------------------------------
# Tile selection with explicit VMEM budgeting (per-generation via get_tpu_info)
# ----------------------------------------------------------------------------
_TM_CANDIDATES = (1024, 512, 256, 128, 64, 32, 16, 8)
_TK_CANDIDATES = (512, 256, 128)
_TN_CANDIDATES = (256, 128)          # 256 fills a v6e/v7x MXU pass when N allows


def _vmem_limits():
    try:
        phys = int(pltpu.get_tpu_info().vmem_capacity_bytes)
    except Exception:
        phys = 64 << 20              # v7x per-TC physical (smallest generation)
    limit = int(min(phys // 2, 48 << 20))   # explicit scoped-VMEM request
    budget = limit - (4 << 20)              # tile working-set budget w/ headroom
    return limit, budget


def _pick_tm(m):
    # Largest aligned row tile; guarantee >=2 parallel row steps when M >= 256
    # so v7x's second TensorCore has work (no effect on v5e/v6e).
    cap = m if m < 256 else m // 2
    for c in _TM_CANDIDATES:
        if c <= cap and m % c == 0:
            return c
    return m                          # full-extent block (legal), never a pad copy


def _footprint(tm, tk, tn, k, out_bytes):
    fp = 2 * (tm * tk * 2 + tk * tn * 2 + tn * 4)   # double-buffered bf16 x/w + f32 bias
    fp += 2 * tm * tn * out_bytes                   # double-buffered output tile
    if tk < k:
        fp += tm * tn * 4                           # f32 accumulator scratch
    return fp


def _choose_tiles(m, k, n, out_bytes, budget):
    tn = n
    for c in _TN_CANDIDATES:
        if n % c == 0:
            tn = c
            break
    tm = _pick_tm(m)
    tk = k                            # prefer a single K step (no acc scratch)
    if _footprint(tm, tk, tn, k, out_bytes) > budget:
        for c in _TK_CANDIDATES:
            if k % c == 0 and _footprint(tm, c, tn, k, out_bytes) <= budget:
                tk = c
                break
    while (_footprint(tm, tk, tn, k, out_bytes) > budget
           and tm >= 16 and tm % 16 == 0):
        tm //= 2
    return tm, tk, tn


def pallas_matmul_bias_act(x, w, b, *, apply_relu, out_dtype):
    """out = act(x @ w + b).  x:(M,K) bf16, w:(K,N) bf16, b:(1,N) f32."""
    m, k = x.shape
    k2, n = w.shape
    assert k == k2 and b.shape == (1, n)
    out_bytes = jnp.dtype(out_dtype).itemsize
    limit, budget = _vmem_limits()
    tm, tk, tn = _choose_tiles(m, k, n, out_bytes, budget)

    cost = pl.CostEstimate(
        flops=2 * m * n * k,
        transcendentals=0,
        bytes_accessed=m * k * 2 + k * n * 2 + n * 4 + m * n * out_bytes)

    if tk == k:                       # ---- single K step: fast path ----
        kernel = functools.partial(_matmul_bias_act_single_k,
                                   apply_relu=apply_relu)
        return pl.pallas_call(
            kernel,
            out_shape=jax.ShapeDtypeStruct((m, n), out_dtype),
            grid_spec=pltpu.PrefetchScalarGridSpec(
                num_scalar_prefetch=0,
                grid=(m // tm, n // tn),
                in_specs=[
                    pl.BlockSpec((tm, k), lambda i, j: (i, 0)),
                    pl.BlockSpec((k, tn), lambda i, j: (0, j)),
                    pl.BlockSpec((1, tn), lambda i, j: (0, j)),
                ],
                out_specs=pl.BlockSpec((tm, tn), lambda i, j: (i, j)),
            ),
            compiler_params=pltpu.CompilerParams(
                dimension_semantics=("parallel", "parallel"),
                vmem_limit_bytes=limit),
            cost_estimate=cost,
        )(x, w, b)

    # ---- generic multi-K path with f32 accumulator ----
    kernel = functools.partial(_matmul_bias_act_multi_k, apply_relu=apply_relu)
    return pl.pallas_call(
        kernel,
        out_shape=jax.ShapeDtypeStruct((m, n), out_dtype),
        grid_spec=pltpu.PrefetchScalarGridSpec(
            num_scalar_prefetch=0,
            grid=(m // tm, n // tn, k // tk),
            in_specs=[
                pl.BlockSpec((tm, tk), lambda i, j, kk: (i, kk)),
                pl.BlockSpec((tk, tn), lambda i, j, kk: (kk, j)),
                pl.BlockSpec((1, tn), lambda i, j, kk: (0, j)),
            ],
            out_specs=pl.BlockSpec((tm, tn), lambda i, j, kk: (i, j)),
            scratch_shapes=[pltpu.VMEM((tm, tn), jnp.float32)],
        ),
        compiler_params=pltpu.CompilerParams(
            dimension_semantics=("parallel", "parallel", "arbitrary"),
            vmem_limit_bytes=limit),
        cost_estimate=cost,
    )(x, w, b)


# ----------------------------------------------------------------------------
# Conv2d(+bias)+ReLU layer in NHWC: patch gather (XLA, fused under jit)
# feeding the fused Pallas GEMM.  Channels already padded to 128 in the weight.
# ----------------------------------------------------------------------------
def conv2d_relu_nhwc(x, w_mat, b, ksize, stride, pad):
    """x:(N,H,W,Cin) bf16; w_mat:(Cin*k*k, Cout_pad) bf16 -> (N,Ho,Wo,Cout_pad) bf16."""
    n = x.shape[0]
    k_dim, c_out_pad = w_mat.shape
    patches = jax.lax.conv_general_dilated_patches(
        x,
        filter_shape=(ksize, ksize),
        window_strides=(stride, stride),
        padding=[(pad, pad), (pad, pad)],
        dimension_numbers=("NHWC", "HWIO", "NHWC"),
    )  # (N, Ho, Wo, Cin*k*k); feature dim ordered (c, kh, kw) -> matches the
    #    PyTorch weight.reshape(Cout, Cin*k*k) flatten order.
    ho, wo = patches.shape[1], patches.shape[2]
    cols = patches.reshape(n * ho * wo, k_dim)
    y = pallas_matmul_bias_act(cols, w_mat, b, apply_relu=True,
                               out_dtype=jnp.bfloat16)
    return y.reshape(n, ho, wo, c_out_pad)


# ----------------------------------------------------------------------------
# Full CNN forward (feature extractor -> flatten -> dense), jitted.
# ----------------------------------------------------------------------------
def make_cnn_forward(kernel_sizes, strides, paddings, nb_classes):
    def forward(params, x_nchw):
        # NCHW -> NHWC once at the boundary; bf16 activations internally.
        x = jnp.transpose(x_nchw, (0, 2, 3, 1)).astype(jnp.bfloat16)
        for (w_mat, b), k, s, p in zip(params["convs"], kernel_sizes,
                                       strides, paddings):
            x = conv2d_relu_nhwc(x, w_mat, b, k, s, p)
        # TODO(synk): activations_hook / gradient capture is a training-time
        # autograd hook with no forward-pass compute; omitted.
        n = x.shape[0]
        x = x.reshape(n, -1)                        # NHWC flatten (padded C)
        dw, db = params["dense"]                    # dw: (F_pad, nb_pad)
        logits_p = pallas_matmul_bias_act(x, dw, db, apply_relu=False,
                                          out_dtype=jnp.float32)
        return logits_p[:, :nb_classes]             # drop padded classes
    return jax.jit(forward)


# ----------------------------------------------------------------------------
# Parameter init (PyTorch layout) + one-time conversion to kernel layout.
# ----------------------------------------------------------------------------
def init_raw_params(key, in_channels, channels, sizes, nb_classes, fe_output):
    raw = {"convs": [], "dense": None}
    c_in = in_channels
    for c, k in zip(channels, sizes):
        key, k1, k2 = jax.random.split(key, 3)
        w = jax.random.normal(k1, (c, c_in, k, k), jnp.float32) * 0.05
        b = jax.random.normal(k2, (c,), jnp.float32) * 0.01
        raw["convs"].append((w, b))
        c_in = c
    key, k1, k2 = jax.random.split(key, 3)
    dw = jax.random.normal(k1, (nb_classes, fe_output), jnp.float32) * 0.05
    db = jax.random.normal(k2, (nb_classes,), jnp.float32) * 0.01
    raw["dense"] = (dw, db)
    return raw


def _round_up(n, m):
    return ((n + m - 1) // m) * m


def prepare_params(raw, fe_chw, lane=128):
    """One-time conversion:
       conv weights -> (Cin_eff*k*k, Cout_pad) bf16 with Cout zero-padded to a
       multiple of `lane` and Cin zero-padded to match the previous layer's
       padded output channels; dense weight permuted from PyTorch NCHW-flatten
       order to (padded) NHWC-flatten order, pre-transposed, classes padded."""
    convs = []
    prev_cout_pad = None
    for li, (w, b) in enumerate(raw["convs"]):
        c_out, c_in, kh, kw = w.shape
        c_out_pad = _round_up(c_out, lane)
        c_in_eff = c_in if li == 0 else prev_cout_pad
        w_p = jnp.zeros((c_out_pad, c_in_eff, kh, kw), jnp.float32)
        w_p = w_p.at[:c_out, :c_in, :, :].set(w)
        w_mat = w_p.reshape(c_out_pad, -1).T.astype(jnp.bfloat16)  # (K, Cout_pad)
        b_p = jnp.zeros((1, c_out_pad), jnp.float32).at[0, :c_out].set(b)
        convs.append((w_mat, b_p))
        prev_cout_pad = c_out_pad

    dw, db = raw["dense"]
    c, h, w_ = fe_chw
    c_pad = prev_cout_pad
    nb = dw.shape[0]
    nb_pad = _round_up(nb, lane)
    dw4 = dw.reshape(nb, c, h, w_)
    dw4p = jnp.zeros((nb_pad, c_pad, h, w_), jnp.float32)
    dw4p = dw4p.at[:nb, :c, :, :].set(dw4)
    dwp = (dw4p.transpose(0, 2, 3, 1)          # CHW-order -> HWC-order (padded)
               .reshape(nb_pad, -1)
               .T.astype(jnp.bfloat16))        # (h*w*c_pad, nb_pad)
    dbp = jnp.zeros((1, nb_pad), jnp.float32).at[0, :nb].set(db)
    return {"convs": convs, "dense": (dwp, dbp)}


# ----------------------------------------------------------------------------
# Pure-JAX NCHW reference (PyTorch semantics) for a correctness check.
# ----------------------------------------------------------------------------
def reference_forward(raw, x_nchw, strides, paddings):
    x = x_nchw
    for (w, b), s, p in zip(raw["convs"], strides, paddings):
        x = jax.lax.conv_general_dilated(
            x, w, window_strides=(s, s), padding=[(p, p), (p, p)],
            dimension_numbers=("NCHW", "OIHW", "NCHW"))
        x = jnp.maximum(x + b[None, :, None, None], 0.0)
    x = x.reshape(x.shape[0], -1)
    dw, db = raw["dense"]
    return x @ dw.T + db


if __name__ == "__main__":
    # Module config (small, consistent with the PyTorch constructor).
    channels = [8, 16]
    sizes = [3, 3]
    strides = [2, 2]
    paddings = [1, 1]
    nb_classes = 10
    image_sizes = (16, 16)
    batch = 2

    # Feature-extractor output shape (3-channel input, like the torch.zeros probe).
    h, w = image_sizes
    for k, s, p in zip(sizes, strides, paddings):
        h = (h + 2 * p - k) // s + 1
        w = (w + 2 * p - k) // s + 1
    fe_chw = (channels[-1], h, w)          # (16, 4, 4)
    fe_output = channels[-1] * h * w       # 256

    key = jax.random.PRNGKey(0)
    key, pk, xk = jax.random.split(key, 3)
    raw = init_raw_params(pk, 3, channels, sizes, nb_classes, fe_output)
    params = prepare_params(raw, fe_chw)
    x = jax.random.normal(xk, (batch, 3, *image_sizes), jnp.float32)

    forward = make_cnn_forward(sizes, strides, paddings, nb_classes)
    logits = forward(params, x)
    jax.block_until_ready(logits)
    assert logits.shape == (batch, nb_classes)

    ref = reference_forward(raw, x, strides, paddings)
    assert jnp.allclose(logits, ref, rtol=5e-2, atol=3e-2), float(
        jnp.max(jnp.abs(logits - ref)))
    print("KERNEL_OK")
</pallas_src>

<mosaic_0001>
module attributes {stable_mosaic.version = 11 : i64} {
  func.func @_matmul_bias_act_single_k(%arg0: i32, %arg1: i32, %arg2: memref<128x27xbf16, #tpu.memory_space<vmem>>, %arg3: memref<27x128xbf16, #tpu.memory_space<vmem>>, %arg4: memref<1x128xf32, #tpu.memory_space<vmem>>, %arg5: memref<128x128xbf16, #tpu.memory_space<vmem>>) attributes {dimension_semantics = [#tpu.dimension_semantics<parallel>, #tpu.dimension_semantics<parallel>], iteration_bounds = array<i64: 1, 1>, scalar_prefetch = 0 : i64, scratch_operands = 0 : i64, tpu.core_type = #tpu.core_type<tc>, window_params = [{transform_indices = @transform_0, window_bounds = array<i64: 128, 27>}, {transform_indices = @transform_1, window_bounds = array<i64: 27, 128>}, {transform_indices = @transform_2, window_bounds = array<i64: 1, 128>}, {transform_indices = @transform_3, window_bounds = array<i64: 128, 128>}]} {
    %c0 = arith.constant 0 : index
    %c0_0 = arith.constant 0 : index
    %0 = vector.load %arg2[%c0, %c0_0] : memref<128x27xbf16, #tpu.memory_space<vmem>>, vector<128x27xbf16>
    %c0_1 = arith.constant 0 : index
    %c0_2 = arith.constant 0 : index
    %1 = vector.load %arg3[%c0_1, %c0_2] : memref<27x128xbf16, #tpu.memory_space<vmem>>, vector<27x128xbf16>
    %cst = arith.constant dense<0.000000e+00> : vector<128x128xf32>
    %2 = tpu.matmul %0, %1, %cst {dimension_numbers = #tpu.dot_dimension_numbers<[1], [0], [0], [1], [0, 0, 1, 1], [], []>} : vector<128x27xbf16>, vector<27x128xbf16>, vector<128x128xf32> -> vector<128x128xf32>
    %c0_3 = arith.constant 0 : index
    %c0_4 = arith.constant 0 : index
    %3 = vector.load %arg4[%c0_3, %c0_4] : memref<1x128xf32, #tpu.memory_space<vmem>>, vector<1x128xf32>
    %4 = vector.broadcast %3 : vector<1x128xf32> to vector<128x128xf32>
    %5 = arith.addf %2, %4 : vector<128x128xf32>
    %cst_5 = arith.constant 0.000000e+00 : f32
    %6 = vector.broadcast %cst_5 : f32 to vector<128x128xf32>
    %7 = arith.maximumf %5, %6 : vector<128x128xf32>
    %8 = arith.truncf %7 : vector<128x128xf32> to vector<128x128xbf16>
    %c0_6 = arith.constant 0 : index
    %c0_7 = arith.constant 0 : index
    %9 = vector.load %arg5[%c0_6, %c0_7] : memref<128x128xbf16, #tpu.memory_space<vmem>>, vector<128x128xbf16>
    tpu.vector_store %arg5[%c0_6, %c0_7], %8 {strides = array<i32>} : memref<128x128xbf16, #tpu.memory_space<vmem>>, vector<128x128xbf16>,
    return
  }
  func.func @transform_0(%arg0: i32, %arg1: i32) -> (i32, i32) {
    %c0_i32 = arith.constant 0 : i32
    %c0_i32_0 = arith.constant 0 : i32
    return %arg0, %c0_i32 : i32, i32
  }
  func.func @transform_1(%arg0: i32, %arg1: i32) -> (i32, i32) {
    %c0_i32 = arith.constant 0 : i32
    %c0_i32_0 = arith.constant 0 : i32
    return %c0_i32, %arg1 : i32, i32
  }
  func.func @transform_2(%arg0: i32, %arg1: i32) -> (i32, i32) {
    %c0_i32 = arith.constant 0 : i32
    %c0_i32_0 = arith.constant 0 : i32
    return %c0_i32, %arg1 : i32, i32
  }
  func.func @transform_3(%arg0: i32, %arg1: i32) -> (i32, i32) {
    %c0_i32 = arith.constant 0 : i32
    return %arg0, %arg1 : i32, i32
  }
}

module attributes {stable_mosaic.version = 11 : i64} {
  func.func @_matmul_bias_act_single_k(%arg0: i32, %arg1: i32, %arg2: memref<32x1152xbf16, #tpu.memory_space<vmem>>, %arg3: memref<1152x128xbf16, #tpu.memory_space<vmem>>, %arg4: memref<1x128xf32, #tpu.memory_space<vmem>>, %arg5: memref<32x128xbf16, #tpu.memory_space<vmem>>) attributes {dimension_semantics = [#tpu.dimension_semantics<parallel>, #tpu.dimension_semantics<parallel>], iteration_bounds = array<i64: 1, 1>, scalar_prefetch = 0 : i64, scratch_operands = 0 : i64, tpu.core_type = #tpu.core_type<tc>, window_params = [{transform_indices = @transform_0, window_bounds = array<i64: 32, 1152>}, {transform_indices = @transform_1, window_bounds = array<i64: 1152, 128>}, {transform_indices = @transform_2, window_bounds = array<i64: 1, 128>}, {transform_indices = @transform_3, window_bounds = array<i64: 32, 128>}]} {
    %c0 = arith.constant 0 : index
    %c0_0 = arith.constant 0 : index
    %0 = vector.load %arg2[%c0, %c0_0] : memref<32x1152xbf16, #tpu.memory_space<vmem>>, vector<32x1152xbf16>
    %c0_1 = arith.constant 0 : index
    %c0_2 = arith.constant 0 : index
    %1 = vector.load %arg3[%c0_1, %c0_2] : memref<1152x128xbf16, #tpu.memory_space<vmem>>, vector<1152x128xbf16>
    %cst = arith.constant dense<0.000000e+00> : vector<32x128xf32>
    %2 = tpu.matmul %0, %1, %cst {dimension_numbers = #tpu.dot_dimension_numbers<[1], [0], [0], [1], [0, 0, 1, 1], [], []>} : vector<32x1152xbf16>, vector<1152x128xbf16>, vector<32x128xf32> -> vector<32x128xf32>
    %c0_3 = arith.constant 0 : index
    %c0_4 = arith.constant 0 : index
    %3 = vector.load %arg4[%c0_3, %c0_4] : memref<1x128xf32, #tpu.memory_space<vmem>>, vector<1x128xf32>
    %4 = vector.broadcast %3 : vector<1x128xf32> to vector<32x128xf32>
    %5 = arith.addf %2, %4 : vector<32x128xf32>
    %cst_5 = arith.constant 0.000000e+00 : f32
    %6 = vector.broadcast %cst_5 : f32 to vector<32x128xf32>
    %7 = arith.maximumf %5, %6 : vector<32x128xf32>
    %8 = arith.truncf %7 : vector<32x128xf32> to vector<32x128xbf16>
    %c0_6 = arith.constant 0 : index
    %c0_7 = arith.constant 0 : index
    %9 = vector.load %arg5[%c0_6, %c0_7] : memref<32x128xbf16, #tpu.memory_space<vmem>>, vector<32x128xbf16>
    tpu.vector_store %arg5[%c0_6, %c0_7], %8 {strides = array<i32>} : memref<32x128xbf16, #tpu.memory_space<vmem>>, vector<32x128xbf16>,
    return
  }
  func.func @transform_0(%arg0: i32, %arg1: i32) -> (i32, i32) {
    %c0_i32 = arith.constant 0 : i32
    %c0_i32_0 = arith.constant 0 : i32
    return %arg0, %c0_i32 : i32, i32
  }
  func.func @transform_1(%arg0: i32, %arg1: i32) -> (i32, i32) {
    %c0_i32 = arith.constant 0 : i32
    %c0_i32_0 = arith.constant 0 : i32
    return %c0_i32, %arg1 : i32, i32
  }
  func.func @transform_2(%arg0: i32, %arg1: i32) -> (i32, i32) {
    %c0_i32 = arith.constant 0 : i32
    %c0_i32_0 = arith.constant 0 : i32
    return %c0_i32, %arg1 : i32, i32
  }
  func.func @transform_3(%arg0: i32, %arg1: i32) -> (i32, i32) {
    %c0_i32 = arith.constant 0 : i32
    return %arg0, %arg1 : i32, i32
  }
}

module attributes {stable_mosaic.version = 11 : i64} {
  func.func @_matmul_bias_act_single_k(%arg0: i32, %arg1: i32, %arg2: memref<2x2048xbf16, #tpu.memory_space<vmem>>, %arg3: memref<2048x128xbf16, #tpu.memory_space<vmem>>, %arg4: memref<1x128xf32, #tpu.memory_space<vmem>>, %arg5: memref<2x128xf32, #tpu.memory_space<vmem>>) attributes {dimension_semantics = [#tpu.dimension_semantics<parallel>, #tpu.dimension_semantics<parallel>], iteration_bounds = array<i64: 1, 1>, scalar_prefetch = 0 : i64, scratch_operands = 0 : i64, tpu.core_type = #tpu.core_type<tc>, window_params = [{transform_indices = @transform_0, window_bounds = array<i64: 2, 2048>}, {transform_indices = @transform_1, window_bounds = array<i64: 2048, 128>}, {transform_indices = @transform_2, window_bounds = array<i64: 1, 128>}, {transform_indices = @transform_3, window_bounds = array<i64: 2, 128>}]} {
    %c0 = arith.constant 0 : index
    %c0_0 = arith.constant 0 : index
    %0 = vector.load %arg2[%c0, %c0_0] : memref<2x2048xbf16, #tpu.memory_space<vmem>>, vector<2x2048xbf16>
    %c0_1 = arith.constant 0 : index
    %c0_2 = arith.constant 0 : index
    %1 = vector.load %arg3[%c0_1, %c0_2] : memref<2048x128xbf16, #tpu.memory_space<vmem>>, vector<2048x128xbf16>
    %cst = arith.constant dense<0.000000e+00> : vector<2x128xf32>
    %2 = tpu.matmul %0, %1, %cst {dimension_numbers = #tpu.dot_dimension_numbers<[1], [0], [0], [1], [0, 0, 1, 1], [], []>} : vector<2x2048xbf16>, vector<2048x128xbf16>, vector<2x128xf32> -> vector<2x128xf32>
    %c0_3 = arith.constant 0 : index
    %c0_4 = arith.constant 0 : index
    %3 = vector.load %arg4[%c0_3, %c0_4] : memref<1x128xf32, #tpu.memory_space<vmem>>, vector<1x128xf32>
    %4 = vector.broadcast %3 : vector<1x128xf32> to vector<2x128xf32>
    %5 = arith.addf %2, %4 : vector<2x128xf32>
    %c0_5 = arith.constant 0 : index
    %c0_6 = arith.constant 0 : index
    %6 = vector.load %arg5[%c0_5, %c0_6] : memref<2x128xf32, #tpu.memory_space<vmem>>, vector<2x128xf32>
    tpu.vector_store %arg5[%c0_5, %c0_6], %5 {strides = array<i32>} : memref<2x128xf32, #tpu.memory_space<vmem>>, vector<2x128xf32>,
    return
  }
  func.func @transform_0(%arg0: i32, %arg1: i32) -> (i32, i32) {
    %c0_i32 = arith.constant 0 : i32
    %c0_i32_0 = arith.constant 0 : i32
    return %arg0, %c0_i32 : i32, i32
  }
  func.func @transform_1(%arg0: i32, %arg1: i32) -> (i32, i32) {
    %c0_i32 = arith.constant 0 : i32
    %c0_i32_0 = arith.constant 0 : i32
    return %c0_i32, %arg1 : i32, i32
  }
  func.func @transform_2(%arg0: i32, %arg1: i32) -> (i32, i32) {
    %c0_i32 = arith.constant 0 : i32
    %c0_i32_0 = arith.constant 0 : i32
    return %c0_i32, %arg1 : i32, i32
  }
  func.func @transform_3(%arg0: i32, %arg1: i32) -> (i32, i32) {
    %c0_i32 = arith.constant 0 : i32
    return %arg0, %arg1 : i32, i32
  }
}

</mosaic_0001>

<bundles_post_ra>
// kernel: forward.3
= control target key start
LH: loop header
LB: loop body
LE: loop exit
PB: predicated region body
PF: predicated region fallthrough
CT: control target
= control target key end

     0   :  { %vm118_vm0 = vcmask 1044480   ;;  %vm119_vm1 = vcmask 1045504   ;;  %v465_v1 = vmov 65535   ;;  %vm93_vm2 = vcmask 220160   ;;  %s551_s1 = inlined_call_operand.vmem [shape: bf16[27,128], index: 1, kind: input, shape index: {}]   ;;  %s552_s0 = inlined_call_operand.vmem [shape: bf16[128,27], index: 0, kind: input, shape index: {}]   ;;  %s553_s2 = inlined_call_operand.vmem [shape: f32[1,128], index: 2, kind: input, shape index: {}]   ;;  %s554_s3 = inlined_call_operand.vmem [shape: bf16[128,128], index: 3, kind: output, shape index: {}]  }
   0x1   :  { %v455_v0 = vld [vmem:[%s551_s1 + $0x8] sm:$0x3f]   ;;  %v120_v2 = vsel %vm118_vm0, 4294967295, %v465_v1  ;;  %v457_v4 = vld [vmem:[%s552_s0] sm:$0xff]   ;;  %v461_v10 = vld [vmem:[%s552_s0 + $0x10] sm:$0xff]  }
   0x2   :  { %v121_v3 = vsel %vm119_vm1, %v120_v2, 0  ;;  %v456_v6 = vld [vmem:[%s551_s1] sm:$0xff]   ;;  %434 = vmatprep.mubr.msk.bf16.mxu0 %vm93_vm2, %v457_v4  ;;  %v459_v8 = vld [vmem:[%s552_s0 + $0x8] sm:$0xff]   ;;  %v462_v11 = vld [vmem:[%s552_s0 + $0x30] sm:$0xff]  }
   0x3   :  { %v123_v5 = vand.u32 %v455_v0, %v121_v3  ;;  %v458_v7 = vld [vmem:[%s552_s0 + $0x20] sm:$0xff]   ;;  %v460_v9 = vld [vmem:[%s552_s0 + $0x28] sm:$0xff]   ;;  %v463_v12 = vld [vmem:[%s552_s0 + $0x18] sm:$0xff]  }
   0x4   :  { %442 = vmatprep.mubr.msk.bf16.mxu1 %vm93_vm2, %v458_v7  ;;  %v464_v13 = vld [vmem:[%s552_s0 + $0x38] sm:$0xff]   ;;  %v322_v14 = vld [vmem:[%s553_s2] ss:$0 sm:$0xff] }
   0x5   :  { %430 = vmatprep.subr.bf16.mxu0 %v123_v5  ;;  %450 = vmatprep.subr.bf16.mxu1 %v123_v5 }
   0x6   :  { %431 = vmatpush3.bf16.msra.mxu0 %v123_v5  ;;  %452 = vmatpush3.bf16.msra.mxu1 %v123_v5 }
   0x7   :  { %432 = vmatprep.subr.bf16.mxu0 %v456_v6  ;;  %451 = vmatprep.subr.bf16.mxu1 %v456_v6 }
   0xa   :  { %433 = vmatpush3.bf16.msra.mxu0 %v456_v6  ;;  %453 = vmatpush3.bf16.msra.mxu1 %v456_v6 }
   0xd   :  { %435 = vmatmul.mubr.msk.bf16.vlgmr.msra.gmra.mxu0 %vm93_vm2, %v459_v8  ;;  %443 = vmatmul.mubr.msk.bf16.vlgmr.msra.gmra.mxu1 %vm93_vm2, %v460_v9 }
   0xe   :  { %438 = vmatprep.mubr.msk.bf16.mxu0 %vm93_vm2, %v461_v10  ;;  %446 = vmatprep.mubr.msk.bf16.mxu1 %vm93_vm2, %v462_v11 }
  0x15   :  { %439 = vmatmul.mubr.msk.bf16.gmra.mxu0 %vm93_vm2, %v463_v12  ;;  %447 = vmatmul.mubr.msk.bf16.gmra.mxu1 %vm93_vm2, %v464_v13 }
  0xcd   :  { %v436_v15 = vpop.f32.mrf.mxu0  ;;  %v444_v16 = vpop.f32.mrf.mxu1 }
  0xce   :  { %v168_v17 = vadd.f32 %v436_v15, %v322_v14  ;;  %v200_v18 = vadd.f32 %v444_v16, %v322_v14 }
  0xcf   :  { %v159_v19 = vpop.f32.mrf.mxu0  ;;  %v191_v20 = vpop.f32.mrf.mxu1 }
  0xd0   :  { %v160_v21 = vadd.f32 %v322_v14, %v159_v19  ;;  %v192_v22 = vadd.f32 %v322_v14, %v191_v20  ;;  %v224_v27 = vmax.f32 %v168_v17, 0.0  ;;  %v232_v28 = vmax.f32 %v200_v18, 0.0 }
  0xd1   :  { %v437_v23 = vpop.f32.mrf.mxu0  ;;  %v445_v24 = vpop.f32.mrf.mxu1 }
  0xd2   :  { %v171_v25 = vadd.f32 %v437_v23, %v322_v14  ;;  %v203_v26 = vadd.f32 %v445_v24, %v322_v14  ;;  %v222_v35 = vmax.f32 %v160_v21, 0.0  ;;  %v230_v36 = vmax.f32 %v192_v22, 0.0 }
  0xd3   :  { %v162_v29 = vpop.f32.mrf.mxu0  ;;  %v194_v30 = vpop.f32.mrf.mxu1 }
  0xd4   :  { %v225_v31 = vmax.f32 %v171_v25, 0.0  ;;  %v233_v32 = vmax.f32 %v203_v26, 0.0  ;;  %v163_v33 = vadd.f32 %v322_v14, %v162_v29  ;;  %v195_v34 = vadd.f32 %v322_v14, %v194_v30 }
  0xd5   :  { %v440_v37 = vpop.f32.mrf.mxu0  ;;  %v448_v38 = vpop.f32.mrf.mxu1 }
  0xd6   :  { %v381_v39 = vpack.c.bf16 %v225_v31, %v224_v27  ;;  %v401_v40 = vpack.c.bf16 %v233_v32, %v232_v28  ;;  %v223_v41 = vmax.f32 %v163_v33, 0.0  ;;  %v231_v42 = vmax.f32 %v195_v34, 0.0 }
  0xd7   :  { %v184_v43 = vadd.f32 %v440_v37, %v322_v14  ;;  %v216_v44 = vadd.f32 %v448_v38, %v322_v14  ;;  %v175_v45 = vpop.f32.mrf.mxu0  ;;  %v207_v46 = vpop.f32.mrf.mxu1 }
  0xd8   :  { %413 = vst [vmem:[%s554_s3 + $0x8] sm:$0xff] %v381_v39   ;;  %417 = vst [vmem:[%s554_s3 + $0x28] sm:$0xff] %v401_v40   ;;  %v376_v47 = vpack.c.bf16 %v223_v41, %v222_v35  ;;  %v396_v48 = vpack.c.bf16 %v231_v42, %v230_v36  ;;  %v176_v49 = vadd.f32 %v322_v14, %v175_v45 }
  0xd9   :  { %v208_v50 = vadd.f32 %v322_v14, %v207_v46  ;;  %v441_v51 = vpop.f32.mrf.mxu0  ;;  %v449_v52 = vpop.f32.mrf.mxu1  ;;  %v228_v55 = vmax.f32 %v184_v43, 0.0  ;;  %v236_v56 = vmax.f32 %v216_v44, 0.0 }
  0xda   :  { %377 = vst [vmem:[%s554_s3] sm:$0xff] %v376_v47   ;;  %416 = vst [vmem:[%s554_s3 + $0x20] sm:$0xff] %v396_v48   ;;  %v187_v53 = vadd.f32 %v441_v51, %v322_v14  ;;  %v219_v54 = vadd.f32 %v449_v52, %v322_v14  ;;  %v226_v63 = vmax.f32 %v176_v49, 0.0 }
  0xdb   :  { %v178_v57 = vpop.f32.mrf.mxu0  ;;  %v210_v58 = vpop.f32.mrf.mxu1  ;;  %v234_v0 = vmax.f32 %v208_v50, 0.0 }
  0xdc   :  { %v229_v59 = vmax.f32 %v187_v53, 0.0  ;;  %v237_v60 = vmax.f32 %v219_v54, 0.0  ;;  %v179_v61 = vadd.f32 %v322_v14, %v178_v57  ;;  %v211_v62 = vadd.f32 %v322_v14, %v210_v58 }
  0xde   :  { %v391_v1 = vpack.c.bf16 %v229_v59, %v228_v55  ;;  %v411_v2 = vpack.c.bf16 %v237_v60, %v236_v56  ;;  %v227_v3 = vmax.f32 %v179_v61, 0.0  ;;  %v235_v4 = vmax.f32 %v211_v62, 0.0 }
  0xe0   :  { %415 = vst [vmem:[%s554_s3 + $0x18] sm:$0xff] %v391_v1   ;;  %419 = vst [vmem:[%s554_s3 + $0x38] sm:$0xff] %v411_v2   ;;  %v386_v5 = vpack.c.bf16 %v227_v3, %v226_v63  ;;  %v406_v6 = vpack.c.bf16 %v235_v4, %v234_v0 }
  0xe2   :  { %414 = vst [vmem:[%s554_s3 + $0x10] sm:$0xff] %v386_v5   ;;  %418 = vst [vmem:[%s554_s3 + $0x30] sm:$0xff] %v406_v6  }

// kernel: forward.4
= control target key start
LH: loop header
LB: loop body
LE: loop exit
PB: predicated region body
PF: predicated region fallthrough
CT: control target
= control target key end

     0   :  { %s1632_s1 = inlined_call_operand.vmem [shape: bf16[1152,128], index: 1, kind: input, shape index: {}]   ;;  %s1633_s0 = inlined_call_operand.vmem [shape: bf16[32,1152], index: 0, kind: input, shape index: {}]   ;;  %s1634_s2 = inlined_call_operand.vmem [shape: f32[1,128], index: 2, kind: input, shape index: {}]   ;;  %s1635_s3 = inlined_call_operand.vmem [shape: bf16[32,128], index: 3, kind: output, shape index: {}]  }
   0x1   :  { %v1235_v0 = vld [vmem:[%s1632_s1 + $0x78] sm:$0xff]   ;;  %v1239_v4 = vld [vmem:[%s1632_s1 + $0x70] sm:$0xff]   ;;  %v1243_v8 = vld [vmem:[%s1632_s1 + $0x68] sm:$0xff]  }
   0x2   :  { %v1236_v1 = vld [vmem:[%s1632_s1 + $0x38] sm:$0xff]   ;;  %1093 = vmatprep.subr.bf16.mxu0 %v1235_v0  ;;  %v1240_v5 = vld [vmem:[%s1632_s1 + $0x30] sm:$0xff]   ;;  %v1244_v9 = vld [vmem:[%s1632_s1 + $0x28] sm:$0xff]  }
   0x3   :  { %v1237_v2 = vld [vmem:[%s1632_s1 + $0xf8] sm:$0xff]   ;;  %1094 = vmatpush3.bf16.msra.mxu0 %v1236_v1  ;;  %v1241_v6 = vld [vmem:[%s1632_s1 + $0xf0] sm:$0xff]   ;;  %v1245_v10 = vld [vmem:[%s1632_s1 + $0xe8] sm:$0xff]  }
   0x4   :  { %v1238_v3 = vld [vmem:[%s1632_s1 + $0xb8] sm:$0xff]   ;;  %1121 = vmatprep.subr.bf16.mxu1 %v1237_v2  ;;  %1095 = vmatprep.subr.bf16.mxu0 %v1239_v4  ;;  %v1242_v7 = vld [vmem:[%s1632_s1 + $0xb0] sm:$0xff]   ;;  %v1246_v11 = vld [vmem:[%s1632_s1 + $0xa8] sm:$0xff]  }
   0x5   :  { %1122 = vmatpush3.bf16.msra.mxu1 %v1238_v3  ;;  %v1247_v12 = vld [vmem:[%s1632_s1 + $0x60] sm:$0xff]   ;;  %v1251_v16 = vld [vmem:[%s1632_s1 + $0x58] sm:$0xff]   ;;  %v1255_v20 = vld [vmem:[%s1632_s1 + $0x50] sm:$0xff]  }
   0x6   :  { %1123 = vmatprep.subr.bf16.mxu1 %v1241_v6  ;;  %v1248_v13 = vld [vmem:[%s1632_s1 + $0x20] sm:$0xff]   ;;  %v1252_v17 = vld [vmem:[%s1632_s1 + $0x18] sm:$0xff]   ;;  %v1256_v21 = vld [vmem:[%s1632_s1 + $0x10] sm:$0xff]  }
   0x7   :  { %1096 = vmatpush3.bf16.msra.mxu0 %v1240_v5  ;;  %v1249_v14 = vld [vmem:[%s1632_s1 + $0xe0] sm:$0xff]   ;;  %v1253_v18 = vld [vmem:[%s1632_s1 + $0xd8] sm:$0xff]   ;;  %v1257_v22 = vld [vmem:[%s1632_s1 + $0xd0] sm:$0xff]  }
   0x8   :  { %1097 = vmatprep.subr.bf16.mxu0 %v1243_v8  ;;  %v1250_v15 = vld [vmem:[%s1632_s1 + $0xa0] sm:$0xff]   ;;  %v1254_v19 = vld [vmem:[%s1632_s1 + $0x98] sm:$0xff]   ;;  %v1258_v23 = vld [vmem:[%s1632_s1 + $0x90] sm:$0xff]  }
   0x9   :  { %1124 = vmatpush3.bf16.msra.mxu1 %v1242_v7  ;;  %v1259_v24 = vld [vmem:[%s1632_s1 + $0x48] sm:$0xff]   ;;  %v1263_v28 = vld [vmem:[%s1632_s1 + $0x40] sm:$0xff]   ;;  %v1270_v34 = vld [vmem:[%s1632_s1 + $0x178] sm:$0xff]  }
   0xa   :  { %1125 = vmatprep.subr.bf16.mxu1 %v1245_v10  ;;  %v1260_v25 = vld [vmem:[%s1632_s1 + $0x8] sm:$0xff]   ;;  %v1264_v29 = vld [vmem:[%s1632_s1] sm:$0xff]   ;;  %v1274_v37 = vld [vmem:[%s1632_s1 + $0x138] sm:$0xff]  }
   0xb   :  { %1098 = vmatpush3.bf16.msra.mxu0 %v1244_v9  ;;  %v1261_v26 = vld [vmem:[%s1632_s1 + $0xc8] sm:$0xff]   ;;  %v1265_v30 = vld [vmem:[%s1632_s1 + $0xc0] sm:$0xff]   ;;  %v1275_v38 = vld [vmem:[%s1632_s1 + $0x1f8] sm:$0xff]  }
   0xc   :  { %1099 = vmatprep.subr.bf16.mxu0 %v1247_v12  ;;  %v1262_v27 = vld [vmem:[%s1632_s1 + $0x88] sm:$0xff]   ;;  %v1266_v31 = vld [vmem:[%s1633_s0] ss:$36 sps:$4 sm:$0xff]   ;;  %v1276_v39 = vld [vmem:[%s1632_s1 + $0x1b8] sm:$0xff]  }
   0xd   :  { %1126 = vmatpush3.bf16.msra.mxu1 %v1246_v11  ;;  %v1268_v32 = vld [vmem:[%s1633_s0 + $0x4] ss:$36 sps:$4 sm:$0xff]   ;;  %v1273_v36 = vld [vmem:[%s1633_s0 + $0xc] ss:$36 sps:$4 sm:$0xff]   ;;  %v1289_v52 = vld [vmem:[%s1632_s1 + $0x158] sm:$0xff]  }
   0xe   :  { %1127 = vmatprep.subr.bf16.mxu1 %v1249_v14  ;;  %v1269_v33 = vld [vmem:[%s1632_s1 + $0x80] sm:$0xff]   ;;  %742 = vmatprep.mubr.bf16.mxu0 %v1268_v32  ;;  %v1271_v35 = vld [vmem:[%s1633_s0 + $0x8] ss:$36 sps:$4 sm:$0xff]   ;;  %v1277_v40 = vld [vmem:[%s1632_s1 + $0x170] sm:$0xff]  }
   0xf   :  { %1100 = vmatpush3.bf16.msra.mxu0 %v1248_v13  ;;  %791 = vmatprep.mubr.bf16.mxu1 %v1273_v36  ;;  %v1278_v41 = vld [vmem:[%s1632_s1 + $0x130] sm:$0xff]   ;;  %v1281_v44 = vld [vmem:[%s1632_s1 + $0x168] sm:$0xff]   ;;  %v1285_v48 = vld [vmem:[%s1632_s1 + $0x160] sm:$0xff]  }
  0x10   :  { %1101 = vmatprep.subr.bf16.mxu0 %v1251_v16  ;;  %v1279_v42 = vld [vmem:[%s1632_s1 + $0x1f0] sm:$0xff]   ;;  %v1282_v45 = vld [vmem:[%s1632_s1 + $0x128] sm:$0xff]   ;;  %v1286_v49 = vld [vmem:[%s1632_s1 + $0x120] sm:$0xff]  }
  0x11   :  { %1128 = vmatpush3.bf16.msra.mxu1 %v1250_v15  ;;  %v1280_v43 = vld [vmem:[%s1632_s1 + $0x1b0] sm:$0xff]   ;;  %v1283_v46 = vld [vmem:[%s1632_s1 + $0x1e8] sm:$0xff]   ;;  %v1287_v50 = vld [vmem:[%s1632_s1 + $0x1e0] sm:$0xff]  }
  0x12   :  { %1129 = vmatprep.subr.bf16.mxu1 %v1253_v18  ;;  %v1284_v47 = vld [vmem:[%s1632_s1 + $0x1a8] sm:$0xff]   ;;  %v1288_v51 = vld [vmem:[%s1632_s1 + $0x1a0] sm:$0xff]   ;;  %v1290_v53 = vld [vmem:[%s1632_s1 + $0x118] sm:$0xff]  }
  0x13   :  { %1102 = vmatpush3.bf16.msra.mxu0 %v1252_v17  ;;  %v1291_v54 = vld [vmem:[%s1633_s0 + $0x4c] ss:$36 sps:$4 sm:$0xff]   ;;  %v1293_v55 = vld [vmem:[%s1632_s1 + $0x1d8] sm:$0xff]   ;;  %v1307_v4 = vld [vmem:[%s1632_s1 + $0x140] sm:$0xff]  }
  0x14   :  { %1103 = vmatprep.subr.bf16.mxu0 %v1255_v20  ;;  %v1294_v56 = vld [vmem:[%s1633_s0 + $0x48] ss:$36 sps:$4 sm:$0xff]   ;;  %v1295_v57 = vld [vmem:[%s1632_s1 + $0x198] sm:$0xff]   ;;  %v1298_v59 = vld [vmem:[%s1632_s1 + $0x150] sm:$0xff]  }
  0x15   :  { %1130 = vmatpush3.bf16.msra.mxu1 %v1254_v19  ;;  %v1296_v58 = vld [vmem:[%s1633_s0 + $0x54] ss:$36 sps:$4 sm:$0xff]   ;;  %v1303_v0 = vld [vmem:[%s1632_s1 + $0x148] sm:$0xff]   ;;  %v1308_v5 = vld [vmem:[%s1632_s1 + $0x100] sm:$0xff]  }
  0x16   :  { %1131 = vmatprep.subr.bf16.mxu1 %v1257_v22  ;;  %v1299_v60 = vld [vmem:[%s1633_s0 + $0x50] ss:$36 sps:$4 sm:$0xff]   ;;  %v1304_v1 = vld [vmem:[%s1632_s1 + $0x108] sm:$0xff]   ;;  %v1309_v6 = vld [vmem:[%s1632_s1 + $0x1c0] sm:$0xff]  }
  0x17   :  { %1104 = vmatpush3.bf16.msra.mxu0 %v1256_v21  ;;  %v1300_v61 = vld [vmem:[%s1632_s1 + $0x110] sm:$0xff]   ;;  %v1305_v2 = vld [vmem:[%s1632_s1 + $0x1c8] sm:$0xff]   ;;  %v1313_v9 = vld [vmem:[%s1632_s1 + $0x180] sm:$0xff]  }
  0x18   :  { %1105 = vmatprep.subr.bf16.mxu0 %v1259_v24  ;;  %v1301_v62 = vld [vmem:[%s1632_s1 + $0x1d0] sm:$0xff]   ;;  %v1306_v3 = vld [vmem:[%s1632_s1 + $0x188] sm:$0xff]   ;;  %v1314_v10 = vld [vmem:[%s1632_s1 + $0x238] sm:$0xff]  }
  0x19   :  { %1132 = vmatpush3.bf16.msra.mxu1 %v1258_v23  ;;  %v1302_v63 = vld [vmem:[%s1632_s1 + $0x190] sm:$0xff]   ;;  %v1315_v11 = vld [vmem:[%s1633_s0 + $0x18] ss:$36 sps:$4 sm:$0xff]   ;;  %v1322_v16 = vld [vmem:[%s1632_s1 + $0x228] sm:$0xff]  }
  0x1a   :  { %1133 = vmatprep.subr.bf16.mxu1 %v1261_v26  ;;  %v1310_v7 = vld [vmem:[%s1633_s0 + $0x10] ss:$36 sps:$4 sm:$0xff]   ;;  %v1317_v12 = vld [vmem:[%s1633_s0 + $0x1c] ss:$36 sps:$4 sm:$0xff]   ;;  %v1323_v17 = vld [vmem:[%s1633_s0 + $0x64] ss:$36 sps:$4 sm:$0xff]  }
  0x1b   :  { %1106 = vmatpush3.bf16.msra.mxu0 %v1260_v25  ;;  %v1312_v8 = vld [vmem:[%s1633_s0 + $0x14] ss:$36 sps:$4 sm:$0xff]   ;;  %v1319_v14 = vld [vmem:[%s1633_s0 + $0x5c] ss:$36 sps:$4 sm:$0xff]   ;;  %v1329_v23 = vld [vmem:[%s1632_s1 + $0x208] sm:$0xff]  }
  0x1c   :  { %1107 = vmatprep.subr.bf16.mxu0 %v1263_v28  ;;  %v1318_v13 = vld [vmem:[%s1632_s1 + $0x230] sm:$0xff]   ;;  %v1321_v15 = vld [vmem:[%s1633_s0 + $0x58] ss:$36 sps:$4 sm:$0xff]   ;;  %v1325_v18 = vld [vmem:[%s1633_s0 + $0x60] ss:$36 sps:$4 sm:$0xff]  }
  0x1d   :  { %1134 = vmatpush3.bf16.msra.mxu1 %v1262_v27  ;;  %v1326_v19 = vld [vmem:[%s1632_s1 + $0x220] sm:$0xff]   ;;  %v1327_v20 = vld [vmem:[%s1632_s1 + $0x218] sm:$0xff]   ;;  %v1328_v22 = vld [vmem:[%s1632_s1 + $0x210] sm:$0xff]  }
  0x1e   :  { %1135 = vmatprep.subr.bf16.mxu1 %v1265_v30  ;;  %v1331_v21 = vld [vmem:[%s1633_s0 + $0x20] ss:$36 sps:$4 sm:$0xff]   ;;  %v1332_v25 = vld [vmem:[%s1633_s0 + $0x68] ss:$36 sps:$4 sm:$0xff]  }
  0x1f   :  { %1108 = vmatpush3.bf16.msra.mxu0 %v1264_v29  ;;  %v1330_v24 = vld [vmem:[%s1632_s1 + $0x200] sm:$0xff]  }
  0x20   :  { %1149 = vmatprep.subr.bf16.mxu0 %v1270_v34 }
  0x21   :  { %1136 = vmatpush3.bf16.msra.mxu1 %v1269_v33 }
  0x22   :  { %743 = vmatmul.mubr.bf16.vlgmr.msra.gmra.mxu0 %v1266_v31  ;;  %1177 = vmatprep.subr.bf16.mxu1 %v1275_v38 }
  0x23   :  { %1150 = vmatpush3.bf16.msra.mxu0 %v1274_v37  ;;  %750 = vmatprep.mubr.bf16.mxu0 %v1291_v54 }
  0x24   :  { %792 = vmatmul.mubr.bf16.vlgmr.msra.gmra.mxu1 %v1271_v35  ;;  %1151 = vmatprep.subr.bf16.mxu0 %v1277_v40 }
  0x25   :  { %1178 = vmatpush3.bf16.msra.mxu1 %v1276_v39  ;;  %799 = vmatprep.mubr.bf16.mxu1 %v1296_v58 }
  0x26   :  { %1179 = vmatprep.subr.bf16.mxu1 %v1279_v42 }
  0x27   :  { %1152 = vmatpush3.bf16.msra.mxu0 %v1278_v41 }
  0x28   :  { %1153 = vmatprep.subr.bf16.mxu0 %v1281_v44 }
  0x29   :  { %1180 = vmatpush3.bf16.msra.mxu1 %v1280_v43 }
  0x2a   :  { %1181 = vmatprep.subr.bf16.mxu1 %v1283_v46  ;;  %751 = vmatmul.mubr.bf16.gmra.mxu0 %v1294_v56 }
  0x2b   :  { %1154 = vmatpush3.bf16.msra.mxu0 %v1282_v45  ;;  %840 = vmatprep.mubr.bf16.mxu0 %v1312_v8 }
  0x2c   :  { %1155 = vmatprep.subr.bf16.mxu0 %v1285_v48  ;;  %800 = vmatmul.mubr.bf16.gmra.mxu1 %v1299_v60 }
  0x2d   :  { %1182 = vmatpush3.bf16.msra.mxu1 %v1284_v47  ;;  %889 = vmatprep.mubr.bf16.mxu1 %v1317_v12 }
  0x2e   :  { %1183 = vmatprep.subr.bf16.mxu1 %v1287_v50 }
  0x2f   :  { %1156 = vmatpush3.bf16.msra.mxu0 %v1286_v49 }
  0x30   :  { %1157 = vmatprep.subr.bf16.mxu0 %v1289_v52 }
  0x31   :  { %1184 = vmatpush3.bf16.msra.mxu1 %v1288_v51 }
  0x32   :  { %1185 = vmatprep.subr.bf16.mxu1 %v1293_v55 }
  0x33   :  { %1158 = vmatpush3.bf16.msra.mxu0 %v1290_v53 }
  0x34   :  { %1159 = vmatprep.subr.bf16.mxu0 %v1298_v59 }
  0x35   :  { %1186 = vmatpush3.bf16.msra.mxu1 %v1295_v57  ;;  %v983_v57 = vld [vmem:[%s1634_s2] ss:$0 sm:$0xff] }
  0x36   :  { %1187 = vmatprep.subr.bf16.mxu1 %v1301_v62 }
  0x37   :  { %1160 = vmatpush3.bf16.msra.mxu0 %v1300_v61 }
  0x38   :  { %1161 = vmatprep.subr.bf16.mxu0 %v1303_v0 }
  0x39   :  { %1188 = vmatpush3.bf16.msra.mxu1 %v1302_v63 }
  0x3a   :  { %1189 = vmatprep.subr.bf16.mxu1 %v1305_v2 }
  0x3b   :  { %1162 = vmatpush3.bf16.msra.mxu0 %v1304_v1 }
  0x3c   :  { %1163 = vmatprep.subr.bf16.mxu0 %v1307_v4 }
  0x3d   :  { %1190 = vmatpush3.bf16.msra.mxu1 %v1306_v3 }
  0x3e   :  { %1191 = vmatprep.subr.bf16.mxu1 %v1309_v6 }
  0x3f   :  { %1164 = vmatpush3.bf16.msra.mxu0 %v1308_v5 }
  0x40   :  { %1215 = vmatprep.subr.bf16.mxu0 %v1314_v10 }
  0x41   :  { %1192 = vmatpush3.bf16.msra.mxu1 %v1313_v9 }
  0x42   :  { %841 = vmatmul.mubr.bf16.vlgmr.msra.gmra.mxu0 %v1310_v7 }
  0x43   :  { %1216 = vmatpush3.bf16.msra.mxu0 %v1314_v10  ;;  %848 = vmatprep.mubr.bf16.mxu0 %v1319_v14 }
  0x44   :  { %890 = vmatmul.mubr.bf16.vlgmr.msra.gmra.mxu1 %v1315_v11  ;;  %1217 = vmatprep.subr.bf16.mxu0 %v1318_v13 }
  0x45   :  { %897 = vmatprep.mubr.bf16.mxu1 %v1323_v17 }
  0x47   :  { %1218 = vmatpush3.bf16.msra.mxu0 %v1318_v13 }
  0x48   :  { %1219 = vmatprep.subr.bf16.mxu0 %v1322_v16 }
  0x4a   :  { %849 = vmatmul.mubr.bf16.gmra.mxu0 %v1321_v15 }
  0x4b   :  { %1220 = vmatpush3.bf16.msra.mxu0 %v1322_v16  ;;  %1231 = vmatprep.mubr.bf16.mxu0 %v1331_v21 }
  0x4c   :  { %898 = vmatmul.mubr.bf16.gmra.mxu1 %v1325_v18  ;;  %1221 = vmatprep.subr.bf16.mxu0 %v1326_v19 }
  0x4f   :  { %1222 = vmatpush3.bf16.msra.mxu0 %v1326_v19 }
  0x50   :  { %1223 = vmatprep.subr.bf16.mxu0 %v1327_v20 }
  0x53   :  { %1224 = vmatpush3.bf16.msra.mxu0 %v1327_v20 }
  0x54   :  { %1225 = vmatprep.subr.bf16.mxu0 %v1328_v22 }
  0x57   :  { %1226 = vmatpush3.bf16.msra.mxu0 %v1328_v22 }
  0x58   :  { %1227 = vmatprep.subr.bf16.mxu0 %v1329_v23 }
  0x5b   :  { %1228 = vmatpush3.bf16.msra.mxu0 %v1329_v23 }
  0x5c   :  { %1229 = vmatprep.subr.bf16.mxu0 %v1330_v24 }
  0x5f   :  { %1230 = vmatpush3.bf16.msra.mxu0 %v1330_v24 }
  0x62   :  { %1232 = vmatmul.mubr.bf16.vlgmr.msra.gmra.mxu0 %v1332_v25 }
  0xe2   :  { %v1109_v26 = vpop.f32.mrf.mxu0 }
  0xe4   :  { %v1137_v27 = vpop.f32.mrf.mxu1  ;;  %v1110_v28 = vpop.f32.mrf.mxu0 }
  0xe5   :  { %v1111_v54 = vadd.f32 %v1110_v28, %v1109_v26 }
  0xe6   :  { %v1138_v29 = vpop.f32.mrf.mxu1  ;;  %v1112_v30 = vpop.f32.mrf.mxu0 }
  0xe7   :  { %v745_v62 = vadd.f32 %v1111_v54, %v983_v57  ;;  %v1139_v63 = vadd.f32 %v1138_v29, %v1137_v27 }
  0xe8   :  { %v1140_v31 = vpop.f32.mrf.mxu1  ;;  %v1113_v32 = vpop.f32.mrf.mxu0 }
  0xe9   :  { %v1114_v59 = vadd.f32 %v1113_v32, %v1112_v30  ;;  %v794_v10 = vadd.f32 %v1139_v63, %v745_v62 }
  0xea   :  { %v1115_v33 = vpop.f32.mrf.mxu0  ;;  %v1141_v34 = vpop.f32.mrf.mxu1 }
  0xeb   :  { %v748_v5 = vadd.f32 %v1114_v59, %v983_v57  ;;  %v1142_v6 = vadd.f32 %v1141_v34, %v1140_v31 }
  0xec   :  { %v1143_v35 = vpop.f32.mrf.mxu1  ;;  %v1116_v36 = vpop.f32.mrf.mxu0 }
  0xed   :  { %v1117_v53 = vadd.f32 %v1116_v36, %v1115_v33  ;;  %v797_v16 = vadd.f32 %v1142_v6, %v748_v5 }
  0xee   :  { %v1144_v37 = vpop.f32.mrf.mxu1  ;;  %v1118_v38 = vpop.f32.mrf.mxu0 }
  0xef   :  { %v753_v60 = vadd.f32 %v1117_v53, %v983_v57  ;;  %v1145_v61 = vadd.f32 %v1144_v37, %v1143_v35 }
  0xf0   :  { %v1146_v39 = vpop.f32.mrf.mxu1  ;;  %v1119_v40 = vpop.f32.mrf.mxu0 }
  0xf1   :  { %v1120_v58 = vadd.f32 %v1119_v40, %v1118_v38  ;;  %v802_v7 = vadd.f32 %v1145_v61, %v753_v60 }
  0xf2   :  { %v1147_v42 = vpop.f32.mrf.mxu1 }
  0xf3   :  { %v756_v2 = vadd.f32 %v1120_v58, %v983_v57  ;;  %v1148_v3 = vadd.f32 %v1147_v42, %v1146_v39 }
  0xf5   :  { %v805_v12 = vadd.f32 %v1148_v3, %v756_v2 }
 0x102   :  { %v1165_v41 = vpop.f32.mrf.mxu0 }
 0x104   :  { %v1166_v43 = vpop.f32.mrf.mxu0  ;;  %v1193_v44 = vpop.f32.mrf.mxu1 }
 0x105   :  { %v1167_v8 = vadd.f32 %v1166_v43, %v1165_v41 }
 0x106   :  { %v1168_v45 = vpop.f32.mrf.mxu0  ;;  %v1194_v46 = vpop.f32.mrf.mxu1 }
 0x107   :  { %v843_v17 = vadd.f32 %v1167_v8, %v794_v10  ;;  %v1195_v18 = vadd.f32 %v1194_v46, %v1193_v44 }
 0x108   :  { %v1169_v47 = vpop.f32.mrf.mxu0  ;;  %v1196_v48 = vpop.f32.mrf.mxu1 }
 0x109   :  { %v1170_v13 = vadd.f32 %v1169_v47, %v1168_v45  ;;  %v892_v27 = vadd.f32 %v1195_v18, %v843_v17 }
 0x10a   :  { %v1171_v49 = vpop.f32.mrf.mxu0  ;;  %v1197_v50 = vpop.f32.mrf.mxu1 }
 0x10b   :  { %v846_v22 = vadd.f32 %v1170_v13, %v797_v16  ;;  %v1198_v23 = vadd.f32 %v1197_v50, %v1196_v48 }
 0x10c   :  { %v1172_v51 = vpop.f32.mrf.mxu0  ;;  %v1199_v52 = vpop.f32.mrf.mxu1 }
 0x10d   :  { %v1173_v4 = vadd.f32 %v1172_v51, %v1171_v49  ;;  %v895_v32 = vadd.f32 %v1198_v23, %v846_v22 }
 0x10e   :  { %v1174_v55 = vpop.f32.mrf.mxu0  ;;  %v1200_v56 = vpop.f32.mrf.mxu1 }
 0x10f   :  { %v851_v14 = vadd.f32 %v1173_v4, %v802_v7  ;;  %v1201_v15 = vadd.f32 %v1200_v56, %v1199_v52 }
 0x110   :  { %v1175_v0 = vpop.f32.mrf.mxu0  ;;  %v1202_v1 = vpop.f32.mrf.mxu1 }
 0x111   :  { %v1176_v9 = vadd.f32 %v1175_v0, %v1174_v55  ;;  %v900_v24 = vadd.f32 %v1201_v15, %v851_v14 }
 0x112   :  { %v1203_v11 = vpop.f32.mrf.mxu1 }
 0x113   :  { %v854_v19 = vadd.f32 %v1176_v9, %v805_v12  ;;  %v1204_v20 = vadd.f32 %v1203_v11, %v1202_v1 }
 0x115   :  { %v903_v28 = vadd.f32 %v1204_v20, %v854_v19 }
 0x122   :  { %v1233_v21 = vpop.f32.mrf.mxu0 }
 0x123   :  { %v949_v26 = vadd.f32 %v1233_v21, %v900_v24 }
 0x124   :  { %v940_v25 = vpop.f32.mrf.mxu0 }
 0x125   :  { %v941_v30 = vadd.f32 %v940_v25, %v892_v27  ;;  %v957_v34 = vmax.f32 %v949_v26, 0.0 }
 0x126   :  { %v1234_v29 = vpop.f32.mrf.mxu0 }
 0x127   :  { %v952_v31 = vadd.f32 %v1234_v29, %v903_v28  ;;  %v955_v37 = vmax.f32 %v941_v30, 0.0 }
 0x128   :  { %v943_v33 = vpop.f32.mrf.mxu0 }
 0x129   :  { %v958_v35 = vmax.f32 %v952_v31, 0.0  ;;  %v944_v36 = vadd.f32 %v943_v33, %v895_v32 }
 0x12b   :  { %v1090_v38 = vpack.c.bf16 %v958_v35, %v957_v34  ;;  %v956_v39 = vmax.f32 %v944_v36, 0.0 }
 0x12d   :  { %1092 = vst [vmem:[%s1635_s3 + $0x8] sm:$0xff] %v1090_v38   ;;  %v1085_v40 = vpack.c.bf16 %v956_v39, %v955_v37 }
 0x12f   :  { %1086 = vst [vmem:[%s1635_s3] sm:$0xff] %v1085_v40  }

// kernel: forward.5
= control target key start
LH: loop header
LB: loop body
LE: loop exit
PB: predicated region body
PF: predicated region fallthrough
CT: control target
= control target key end

     0   :  { %v287_v28 = vlaneseq  ;;  %v1959_v36 = vmov 1966171168   ;;  %s2401_s0 = inlined_call_operand.vmem [shape: bf16[2,2048], index: 0, kind: input, shape index: {}]   ;;  %s2402_s1 = inlined_call_operand.vmem [shape: bf16[2048,128], index: 1, kind: input, shape index: {}]   ;;  %s2403_s2 = inlined_call_operand.vmem [shape: f32[1,128], index: 2, kind: input, shape index: {}]   ;;  %s2404_s3 = inlined_call_operand.hbm [shape: f32[2,128], index: 3, kind: output, shape index: {}]  }
   0x1   :  { %v1807_v0 = vld [vmem:[%s2402_s1 + $0x78] sm:$0xff]   ;;  %v1811_v4 = vld [vmem:[%s2402_s1 + $0x70] sm:$0xff]   ;;  %v1815_v8 = vld [vmem:[%s2402_s1 + $0x68] sm:$0xff]   ;;  %v285_v37 = vunpack.c.l.s4 %v1959_v36 }
   0x2   :  { %v1808_v1 = vld [vmem:[%s2402_s1 + $0xf8] sm:$0xff]   ;;  %1629 = vmatprep.subr.bf16.mxu0 %v1807_v0  ;;  %v1812_v5 = vld [vmem:[%s2402_s1 + $0xf0] sm:$0xff]   ;;  %v1816_v9 = vld [vmem:[%s2402_s1 + $0xe8] sm:$0xff]   ;;  %v288_v33 = vshrl.u32 %v287_v28, 7 }
   0x3   :  { %v1809_v2 = vld [vmem:[%s2402_s1 + $0x38] sm:$0xff]   ;;  %1651 = vmatprep.subr.bf16.mxu1 %v1808_v1  ;;  %v1813_v6 = vld [vmem:[%s2402_s1 + $0x30] sm:$0xff]   ;;  %v1817_v10 = vld [vmem:[%s2402_s1 + $0x28] sm:$0xff]   ;;  %v286_v40 = vunpack.c.0.s8 %v285_v37 }
   0x4   :  { %v1810_v3 = vld [vmem:[%s2402_s1 + $0xb8] sm:$0xff]   ;;  %1630 = vmatpush3.bf16.msra.mxu0 %v1809_v2  ;;  %v1814_v7 = vld [vmem:[%s2402_s1 + $0xb0] sm:$0xff]   ;;  %v1818_v11 = vld [vmem:[%s2402_s1 + $0xa8] sm:$0xff]  }
   0x5   :  { %1652 = vmatpush3.bf16.msra.mxu1 %v1810_v3  ;;  %1631 = vmatprep.subr.bf16.mxu0 %v1811_v4  ;;  %v1819_v12 = vld [vmem:[%s2402_s1 + $0x60] sm:$0xff]   ;;  %v1823_v16 = vld [vmem:[%s2402_s1 + $0x58] sm:$0xff]   ;;  %v1827_v20 = vld [vmem:[%s2402_s1 + $0x50] sm:$0xff]   ;;  %v2086_v41 = vsub.s32 %v286_v40, %v288_v33 }
   0x6   :  { %1653 = vmatprep.subr.bf16.mxu1 %v1812_v5  ;;  %v1820_v13 = vld [vmem:[%s2402_s1 + $0xe0] sm:$0xff]   ;;  %v1824_v17 = vld [vmem:[%s2402_s1 + $0xd8] sm:$0xff]   ;;  %v1828_v21 = vld [vmem:[%s2402_s1 + $0xd0] sm:$0xff]  }
   0x7   :  { %v1821_v14 = vld [vmem:[%s2402_s1 + $0x20] sm:$0xff]   ;;  %v1825_v18 = vld [vmem:[%s2402_s1 + $0x18] sm:$0xff]   ;;  %v1829_v22 = vld [vmem:[%s2402_s1 + $0x10] sm:$0xff]  }
   0x8   :  { %1632 = vmatpush3.bf16.msra.mxu0 %v1813_v6  ;;  %v1822_v15 = vld [vmem:[%s2402_s1 + $0xa0] sm:$0xff]   ;;  %v1826_v19 = vld [vmem:[%s2402_s1 + $0x98] sm:$0xff]   ;;  %v1830_v23 = vld [vmem:[%s2402_s1 + $0x90] sm:$0xff]  }
   0x9   :  { %1654 = vmatpush3.bf16.msra.mxu1 %v1814_v7  ;;  %1633 = vmatprep.subr.bf16.mxu0 %v1815_v8  ;;  %v1831_v24 = vld [vmem:[%s2402_s1 + $0x48] sm:$0xff]   ;;  %v1835_v29 = vld [vmem:[%s2402_s1 + $0x40] sm:$0xff]   ;;  %v1840_v35 = vld [vmem:[%s2402_s1 + $0x178] sm:$0xff]  }
   0xa   :  { %1655 = vmatprep.subr.bf16.mxu1 %v1816_v9  ;;  %v1832_v25 = vld [vmem:[%s2402_s1 + $0xc8] sm:$0xff]   ;;  %v1836_v30 = vld [vmem:[%s2402_s1 + $0xc0] sm:$0xff]   ;;  %v1841_v38 = vld [vmem:[%s2402_s1 + $0x1f8] sm:$0xff]  }
   0xb   :  { %v1833_v26 = vld [vmem:[%s2402_s1 + $0x8] sm:$0xff]   ;;  %v1837_v31 = vld [vmem:[%s2402_s1] sm:$0xff]   ;;  %v1842_v48 = vld [vmem:[%s2402_s1 + $0x138] sm:$0xff]  }
   0xc   :  { %1634 = vmatpush3.bf16.msra.mxu0 %v1817_v10  ;;  %v1834_v27 = vld [vmem:[%s2402_s1 + $0x88] sm:$0xff]   ;;  %v1838_v32 = vld [vmem:[%s2402_s1 + $0x80] sm:$0xff]   ;;  %v1844_v51 = vld [vmem:[%s2402_s1 + $0x170] sm:$0xff]  }
   0xd   :  { %1656 = vmatpush3.bf16.msra.mxu1 %v1818_v11  ;;  %1635 = vmatprep.subr.bf16.mxu0 %v1819_v12  ;;  %v16_v34 = vld [vmem:[%s2401_s0] sm:$0xff]  ;;  %v1843_v53 = vld [vmem:[%s2402_s1 + $0x1b8] sm:$0xff]   ;;  %v1845_v54 = vld [vmem:[%s2402_s1 + $0x1f0] sm:$0xff]  }
   0xe   :  { %1657 = vmatprep.subr.bf16.mxu1 %v1820_v13  ;;  %v283_v39 = vcombine.high %v16_v34, %v16_v34  ;;  %v290_v42 = vrot.slane %v16_v34, %v2086_v41  ;;  %v1846_v56 = vld [vmem:[%s2402_s1 + $0x130] sm:$0xff]   ;;  %v1848_v57 = vld [vmem:[%s2402_s1 + $0x168] sm:$0xff]   ;;  %v1852_v61 = vld [vmem:[%s2402_s1 + $0x160] sm:$0xff]  }
   0xf   :  { %v1847_v58 = vld [vmem:[%s2402_s1 + $0x1b0] sm:$0xff]   ;;  %v1849_v59 = vld [vmem:[%s2402_s1 + $0x1e8] sm:$0xff]   ;;  %v1853_v63 = vld [vmem:[%s2402_s1 + $0x1e0] sm:$0xff]  }
  0x10   :  { %1636 = vmatpush3.bf16.msra.mxu0 %v1821_v14  ;;  %v2090_v43 = vrot.slane %v283_v39, %v2086_v41  ;;  %v298_v44 = vcombine.high %v290_v42, %v290_v42  ;;  %v306_v45 = vrot.slane %v290_v42, %v2086_v41  ;;  %v1850_v60 = vld [vmem:[%s2402_s1 + $0x128] sm:$0xff]   ;;  %v1854_v0 = vld [vmem:[%s2402_s1 + $0x120] sm:$0xff]   ;;  %v1856_v1 = vld [vmem:[%s2402_s1 + $0x158] sm:$0xff]  }
  0x11   :  { %1658 = vmatpush3.bf16.msra.mxu1 %v1822_v15  ;;  %1637 = vmatprep.subr.bf16.mxu0 %v1823_v16  ;;  %v1851_v62 = vld [vmem:[%s2402_s1 + $0x1a8] sm:$0xff]   ;;  %v1855_v2 = vld [vmem:[%s2402_s1 + $0x1a0] sm:$0xff]   ;;  %v1857_v3 = vld [vmem:[%s2402_s1 + $0x1d8] sm:$0xff]  }
  0x12   :  { %1659 = vmatprep.subr.bf16.mxu1 %v1824_v17  ;;  %v299_v46 = vcombine.high %v2090_v43, %v2090_v43  ;;  %v320_v47 = vrot.slane %v298_v44, %v2086_v41  ;;  %v328_v50 = vcombine.high %v306_v45, %v306_v45  ;;  %v1858_v4 = vld [vmem:[%s2402_s1 + $0x118] sm:$0xff]   ;;  %v1860_v5 = vld [vmem:[%s2402_s1 + $0x150] sm:$0xff]   ;;  %v1864_v9 = vld [vmem:[%s2402_s1 + $0x148] sm:$0xff]   ;;  %v313_v17 = vrot.slane %v2090_v43, %v2086_v41 }
  0x13   :  { %v1859_v6 = vld [vmem:[%s2402_s1 + $0x198] sm:$0xff]   ;;  %v1861_v7 = vld [vmem:[%s2402_s1 + $0x1d0] sm:$0xff]   ;;  %v1865_v11 = vld [vmem:[%s2402_s1 + $0x1c8] sm:$0xff]  }
  0x14   :  { %1638 = vmatpush3.bf16.msra.mxu0 %v1825_v18  ;;  %v327_v49 = vrot.slane %v299_v46, %v2086_v41  ;;  %1197 = vmatprep.mubr.bf16.mxu0 %v320_v47  ;;  %v330_v52 = vcombine.high %v320_v47, %v320_v47  ;;  %v1862_v8 = vld [vmem:[%s2402_s1 + $0x110] sm:$0xff]   ;;  %v1866_v12 = vld [vmem:[%s2402_s1 + $0x108] sm:$0xff]   ;;  %v1868_v13 = vld [vmem:[%s2402_s1 + $0x140] sm:$0xff]  }
  0x15   :  { %1660 = vmatpush3.bf16.msra.mxu1 %v1826_v19  ;;  %1639 = vmatprep.subr.bf16.mxu0 %v1827_v20  ;;  %v1863_v10 = vld [vmem:[%s2402_s1 + $0x190] sm:$0xff]   ;;  %v1867_v14 = vld [vmem:[%s2402_s1 + $0x188] sm:$0xff]   ;;  %v1869_v15 = vld [vmem:[%s2402_s1 + $0x1c0] sm:$0xff]  }
  0x16   :  { %1661 = vmatprep.subr.bf16.mxu1 %v1828_v21  ;;  %v331_v55 = vcombine.high %v327_v49, %v327_v49  ;;  %1237 = vmatprep.mubr.bf16.mxu1 %v330_v52  ;;  %v1870_v16 = vld [vmem:[%s2402_s1 + $0x100] sm:$0xff]   ;;  %v1872_v18 = vld [vmem:[%s2402_s1 + $0x278] sm:$0xff]   ;;  %v1879_v28 = vld [vmem:[%s2402_s1 + $0x2b0] sm:$0xff]  }
  0x17   :  { %v1871_v19 = vld [vmem:[%s2402_s1 + $0x180] sm:$0xff]   ;;  %v1873_v20 = vld [vmem:[%s2402_s1 + $0x2f8] sm:$0xff]   ;;  %v1892_v39 = vld [vmem:[%s2402_s1 + $0x250] sm:$0xff]  }
  0x18   :  { %1640 = vmatpush3.bf16.msra.mxu0 %v1829_v22  ;;  %v1874_v21 = vld [vmem:[%s2402_s1 + $0x238] sm:$0xff]   ;;  %v329_v22 = vcombine.high %v313_v17, %v313_v17  ;;  %v1885_v33 = vld [vmem:[%s2402_s1 + $0x2e0] sm:$0xff]   ;;  %v1893_v42 = vld [vmem:[%s2402_s1 + $0x2d0] sm:$0xff]  }
  0x19   :  { %1662 = vmatpush3.bf16.msra.mxu1 %v1830_v23  ;;  %1641 = vmatprep.subr.bf16.mxu0 %v1831_v24  ;;  %v1876_v23 = vld [vmem:[%s2402_s1 + $0x270] sm:$0xff]   ;;  %v1875_v24 = vld [vmem:[%s2402_s1 + $0x2b8] sm:$0xff]   ;;  %v1886_v34 = vld [vmem:[%s2402_s1 + $0x220] sm:$0xff]  }
  0x1a   :  { %1663 = vmatprep.subr.bf16.mxu1 %v1832_v25  ;;  %v1877_v25 = vld [vmem:[%s2402_s1 + $0x2f0] sm:$0xff]   ;;  %v1887_v36 = vld [vmem:[%s2402_s1 + $0x2a0] sm:$0xff]   ;;  %v1889_v37 = vld [vmem:[%s2402_s1 + $0x2d8] sm:$0xff]  }
  0x1b   :  { %v1891_v40 = vld [vmem:[%s2402_s1 + $0x298] sm:$0xff]   ;;  %v1894_v43 = vld [vmem:[%s2402_s1 + $0x210] sm:$0xff]   ;;  %v1896_v44 = vld [vmem:[%s2402_s1 + $0x248] sm:$0xff]  }
  0x1c   :  { %1642 = vmatpush3.bf16.msra.mxu0 %v1833_v26  ;;  %v1878_v26 = vld [vmem:[%s2402_s1 + $0x230] sm:$0xff]  }
  0x1d   :  { %1664 = vmatpush3.bf16.msra.mxu1 %v1834_v27  ;;  %1643 = vmatprep.subr.bf16.mxu0 %v1835_v29  ;;  %v1880_v27 = vld [vmem:[%s2402_s1 + $0x268] sm:$0xff]   ;;  %v1895_v46 = vld [vmem:[%s2402_s1 + $0x290] sm:$0xff]  }
  0x1e   :  { %1665 = vmatprep.subr.bf16.mxu1 %v1836_v30  ;;  %v1881_v29 = vld [vmem:[%s2402_s1 + $0x2e8] sm:$0xff]  }
  0x1f   :  { %v1882_v30 = vld [vmem:[%s2402_s1 + $0x228] sm:$0xff]  }
  0x20   :  { %1644 = vmatpush3.bf16.msra.mxu0 %v1837_v31  ;;  %v1884_v31 = vld [vmem:[%s2402_s1 + $0x260] sm:$0xff]  }
  0x21   :  { %1666 = vmatpush3.bf16.msra.mxu1 %v1838_v32  ;;  %1673 = vmatprep.subr.bf16.mxu0 %v1840_v35  ;;  %v1883_v32 = vld [vmem:[%s2402_s1 + $0x2a8] sm:$0xff]   ;;  %v1888_v35 = vld [vmem:[%s2402_s1 + $0x258] sm:$0xff]  }
  0x22   :  { %1695 = vmatprep.subr.bf16.mxu1 %v1841_v38  ;;  %v1890_v38 = vld [vmem:[%s2402_s1 + $0x218] sm:$0xff]  }
  0x23   :  { %1198 = vmatmul.mubr.bf16.vlgmr.msra.gmra.mxu0 %v306_v45  ;;  %v17_v45 = vld [vmem:[%s2401_s0 + $0x8] sm:$0xff] }
  0x24   :  { %1674 = vmatpush3.bf16.msra.mxu0 %v1842_v48  ;;  %1238 = vmatmul.mubr.bf16.vlgmr.msra.gmra.mxu1 %v328_v50  ;;  %v339_v47 = vrot.slane %v17_v45, %v2086_v41  ;;  %v332_v48 = vcombine.high %v17_v45, %v17_v45  ;;  %v1898_v50 = vld [vmem:[%s2402_s1 + $0x208] sm:$0xff]  }
  0x25   :  { %1675 = vmatprep.subr.bf16.mxu0 %v1844_v51  ;;  %1696 = vmatpush3.bf16.msra.mxu1 %v1843_v53  ;;  %v1900_v53 = vld [vmem:[%s2402_s1 + $0x240] sm:$0xff]  }
  0x26   :  { %1277 = vmatprep.mubr.bf16.mxu0 %v327_v49  ;;  %1697 = vmatprep.subr.bf16.mxu1 %v1845_v54  ;;  %v1897_v49 = vld [vmem:[%s2402_s1 + $0x2c8] sm:$0xff]   ;;  %v347_v51 = vcombine.high %v339_v47, %v339_v47  ;;  %v2275_v52 = vrot.slane %v332_v48, %v2086_v41 }
  0x27   :  { %1317 = vmatprep.mubr.bf16.mxu1 %v331_v55  ;;  %v1899_v54 = vld [vmem:[%s2402_s1 + $0x288] sm:$0xff]  }
  0x28   :  { %1676 = vmatpush3.bf16.msra.mxu0 %v1846_v56  ;;  %v369_v55 = vrot.slane %v347_v51, %v2086_v41  ;;  %v348_v56 = vcombine.high %v2275_v52, %v2275_v52 }
  0x29   :  { %1677 = vmatprep.subr.bf16.mxu0 %v1848_v57  ;;  %1698 = vmatpush3.bf16.msra.mxu1 %v1847_v58  ;;  %v1901_v57 = vld [vmem:[%s2402_s1 + $0x2c0] sm:$0xff]  }
  0x2a   :  { %1699 = vmatprep.subr.bf16.mxu1 %v1849_v59  ;;  %v1902_v58 = vld [vmem:[%s2402_s1 + $0x200] sm:$0xff]   ;;  %v379_v59 = vcombine.high %v369_v55, %v369_v55 }
  0x2c   :  { %1678 = vmatpush3.bf16.msra.mxu0 %v1850_v60  ;;  %v355_v60 = vrot.slane %v339_v47, %v2086_v41 }
  0x2d   :  { %1679 = vmatprep.subr.bf16.mxu0 %v1852_v61  ;;  %1700 = vmatpush3.bf16.msra.mxu1 %v1851_v62  ;;  %v1904_v61 = vld [vmem:[%s2402_s1 + $0x378] sm:$0xff]   ;;  %v1903_v62 = vld [vmem:[%s2402_s1 + $0x280] sm:$0xff]  }
  0x2e   :  { %1701 = vmatprep.subr.bf16.mxu1 %v1853_v63  ;;  %v376_v63 = vrot.slane %v348_v56, %v2086_v41 }
  0x30   :  { %1680 = vmatpush3.bf16.msra.mxu0 %v1854_v0  ;;  %v1905_v0 = vld [vmem:[%s2402_s1 + $0x3f8] sm:$0xff]  }
  0x31   :  { %1681 = vmatprep.subr.bf16.mxu0 %v1856_v1  ;;  %1702 = vmatpush3.bf16.msra.mxu1 %v1855_v2  ;;  %v1906_v1 = vld [vmem:[%s2402_s1 + $0x338] sm:$0xff]   ;;  %v377_v2 = vcombine.high %v355_v60, %v355_v60 }
  0x32   :  { %1703 = vmatprep.subr.bf16.mxu1 %v1857_v3  ;;  %v1908_v3 = vld [vmem:[%s2402_s1 + $0x370] sm:$0xff]  }
  0x34   :  { %1682 = vmatpush3.bf16.msra.mxu0 %v1858_v4  ;;  %v1907_v4 = vld [vmem:[%s2402_s1 + $0x3b8] sm:$0xff]  }
  0x35   :  { %1683 = vmatprep.subr.bf16.mxu0 %v1860_v5  ;;  %1704 = vmatpush3.bf16.msra.mxu1 %v1859_v6  ;;  %v380_v5 = vcombine.high %v376_v63, %v376_v63  ;;  %v1909_v6 = vld [vmem:[%s2402_s1 + $0x3f0] sm:$0xff]  }
  0x36   :  { %1705 = vmatprep.subr.bf16.mxu1 %v1861_v7  ;;  %v1910_v7 = vld [vmem:[%s2402_s1 + $0x330] sm:$0xff]  }
  0x38   :  { %1684 = vmatpush3.bf16.msra.mxu0 %v1862_v8  ;;  %v1912_v8 = vld [vmem:[%s2402_s1 + $0x368] sm:$0xff]  }
  0x39   :  { %1685 = vmatprep.subr.bf16.mxu0 %v1864_v9  ;;  %1706 = vmatpush3.bf16.msra.mxu1 %v1863_v10  ;;  %v1911_v9 = vld [vmem:[%s2402_s1 + $0x3b0] sm:$0xff]   ;;  %v1913_v10 = vld [vmem:[%s2402_s1 + $0x3e8] sm:$0xff]  }
  0x3a   :  { %1707 = vmatprep.subr.bf16.mxu1 %v1865_v11  ;;  %v1914_v11 = vld [vmem:[%s2402_s1 + $0x328] sm:$0xff]  }
  0x3c   :  { %1686 = vmatpush3.bf16.msra.mxu0 %v1866_v12  ;;  %v1916_v12 = vld [vmem:[%s2402_s1 + $0x360] sm:$0xff]  }
  0x3d   :  { %1687 = vmatprep.subr.bf16.mxu0 %v1868_v13  ;;  %1708 = vmatpush3.bf16.msra.mxu1 %v1867_v14  ;;  %v1915_v13 = vld [vmem:[%s2402_s1 + $0x3a8] sm:$0xff]   ;;  %v1917_v14 = vld [vmem:[%s2402_s1 + $0x3e0] sm:$0xff]  }
  0x3e   :  { %1709 = vmatprep.subr.bf16.mxu1 %v1869_v15  ;;  %v1918_v15 = vld [vmem:[%s2402_s1 + $0x320] sm:$0xff]  }
  0x40   :  { %1688 = vmatpush3.bf16.msra.mxu0 %v1870_v16  ;;  %v1920_v16 = vld [vmem:[%s2402_s1 + $0x358] sm:$0xff]  }
  0x41   :  { %1717 = vmatprep.subr.bf16.mxu0 %v1872_v18  ;;  %1710 = vmatpush3.bf16.msra.mxu1 %v1871_v19  ;;  %v1921_v18 = vld [vmem:[%s2402_s1 + $0x3d8] sm:$0xff]  }
  0x42   :  { %1739 = vmatprep.subr.bf16.mxu1 %v1873_v20  ;;  %v1922_v19 = vld [vmem:[%s2402_s1 + $0x318] sm:$0xff]   ;;  %v1924_v20 = vld [vmem:[%s2402_s1 + $0x350] sm:$0xff]  }
  0x43   :  { %1278 = vmatmul.mubr.bf16.vlgmr.msra.gmra.mxu0 %v313_v17  ;;  %v1919_v17 = vld [vmem:[%s2402_s1 + $0x3a0] sm:$0xff]  }
  0x44   :  { %1718 = vmatpush3.bf16.msra.mxu0 %v1874_v21  ;;  %1318 = vmatmul.mubr.bf16.vlgmr.msra.gmra.mxu1 %v329_v22  ;;  %v1923_v21 = vld [vmem:[%s2402_s1 + $0x398] sm:$0xff]   ;;  %v1925_v22 = vld [vmem:[%s2402_s1 + $0x3d0] sm:$0xff]  }
  0x45   :  { %1719 = vmatprep.subr.bf16.mxu0 %v1876_v23  ;;  %1740 = vmatpush3.bf16.msra.mxu1 %v1875_v24  ;;  %v1926_v23 = vld [vmem:[%s2402_s1 + $0x310] sm:$0xff]   ;;  %v1928_v24 = vld [vmem:[%s2402_s1 + $0x348] sm:$0xff]  }
  0x46   :  { %1741 = vmatprep.subr.bf16.mxu1 %v1877_v25  ;;  %1357 = vmatprep.mubr.bf16.mxu0 %v369_v55  ;;  %v1927_v25 = vld [vmem:[%s2402_s1 + $0x390] sm:$0xff]  }
  0x47   :  { %1397 = vmatprep.mubr.bf16.mxu1 %v379_v59 }
  0x48   :  { %1720 = vmatpush3.bf16.msra.mxu0 %v1878_v26 }
  0x49   :  { %1721 = vmatprep.subr.bf16.mxu0 %v1880_v27  ;;  %1742 = vmatpush3.bf16.msra.mxu1 %v1879_v28 }
  0x4a   :  { %1743 = vmatprep.subr.bf16.mxu1 %v1881_v29 }
  0x4c   :  { %1722 = vmatpush3.bf16.msra.mxu0 %v1882_v30 }
  0x4d   :  { %1723 = vmatprep.subr.bf16.mxu0 %v1884_v31  ;;  %1744 = vmatpush3.bf16.msra.mxu1 %v1883_v32 }
  0x4e   :  { %1745 = vmatprep.subr.bf16.mxu1 %v1885_v33 }
  0x50   :  { %1724 = vmatpush3.bf16.msra.mxu0 %v1886_v34 }
  0x51   :  { %1725 = vmatprep.subr.bf16.mxu0 %v1888_v35  ;;  %1746 = vmatpush3.bf16.msra.mxu1 %v1887_v36 }
  0x52   :  { %1747 = vmatprep.subr.bf16.mxu1 %v1889_v37 }
  0x54   :  { %1726 = vmatpush3.bf16.msra.mxu0 %v1890_v38 }
  0x55   :  { %1727 = vmatprep.subr.bf16.mxu0 %v1892_v39  ;;  %1748 = vmatpush3.bf16.msra.mxu1 %v1891_v40 }
  0x56   :  { %1749 = vmatprep.subr.bf16.mxu1 %v1893_v42 }
  0x58   :  { %1728 = vmatpush3.bf16.msra.mxu0 %v1894_v43 }
  0x59   :  { %1729 = vmatprep.subr.bf16.mxu0 %v1896_v44  ;;  %1750 = vmatpush3.bf16.msra.mxu1 %v1895_v46 }
  0x5a   :  { %1751 = vmatprep.subr.bf16.mxu1 %v1897_v49 }
  0x5c   :  { %1730 = vmatpush3.bf16.msra.mxu0 %v1898_v50 }
  0x5d   :  { %1731 = vmatprep.subr.bf16.mxu0 %v1900_v53  ;;  %1752 = vmatpush3.bf16.msra.mxu1 %v1899_v54 }
  0x5e   :  { %1753 = vmatprep.subr.bf16.mxu1 %v1901_v57 }
  0x60   :  { %1732 = vmatpush3.bf16.msra.mxu0 %v1902_v58 }
  0x61   :  { %1761 = vmatprep.subr.bf16.mxu0 %v1904_v61  ;;  %1754 = vmatpush3.bf16.msra.mxu1 %v1903_v62 }
  0x62   :  { %1783 = vmatprep.subr.bf16.mxu1 %v1905_v0 }
  0x63   :  { %1358 = vmatmul.mubr.bf16.vlgmr.msra.gmra.mxu0 %v355_v60 }
  0x64   :  { %1762 = vmatpush3.bf16.msra.mxu0 %v1906_v1  ;;  %1437 = vmatprep.mubr.bf16.mxu0 %v376_v63 }
  0x65   :  { %1398 = vmatmul.mubr.bf16.vlgmr.msra.gmra.mxu1 %v377_v2  ;;  %1763 = vmatprep.subr.bf16.mxu0 %v1908_v3 }
  0x66   :  { %1784 = vmatpush3.bf16.msra.mxu1 %v1907_v4  ;;  %1477 = vmatprep.mubr.bf16.mxu1 %v380_v5 }
  0x67   :  { %1785 = vmatprep.subr.bf16.mxu1 %v1909_v6 }
  0x68   :  { %1764 = vmatpush3.bf16.msra.mxu0 %v1910_v7 }
  0x69   :  { %1765 = vmatprep.subr.bf16.mxu0 %v1912_v8 }
  0x6a   :  { %1786 = vmatpush3.bf16.msra.mxu1 %v1911_v9 }
  0x6b   :  { %1787 = vmatprep.subr.bf16.mxu1 %v1913_v10 }
  0x6c   :  { %1766 = vmatpush3.bf16.msra.mxu0 %v1914_v11 }
  0x6d   :  { %1767 = vmatprep.subr.bf16.mxu0 %v1916_v12 }
  0x6e   :  { %1788 = vmatpush3.bf16.msra.mxu1 %v1915_v13 }
  0x6f   :  { %1789 = vmatprep.subr.bf16.mxu1 %v1917_v14 }
  0x70   :  { %1768 = vmatpush3.bf16.msra.mxu0 %v1918_v15 }
  0x71   :  { %1769 = vmatprep.subr.bf16.mxu0 %v1920_v16 }
  0x72   :  { %1790 = vmatpush3.bf16.msra.mxu1 %v1919_v17 }
  0x73   :  { %1791 = vmatprep.subr.bf16.mxu1 %v1921_v18 }
  0x74   :  { %1770 = vmatpush3.bf16.msra.mxu0 %v1922_v19 }
  0x75   :  { %1771 = vmatprep.subr.bf16.mxu0 %v1924_v20 }
  0x76   :  { %1792 = vmatpush3.bf16.msra.mxu1 %v1923_v21 }
  0x77   :  { %8 = vsyncpa [#allocation3], 0  ;;  %1793 = vmatprep.subr.bf16.mxu1 %v1925_v22  ;;  %v1929_v26 = vld [vmem:[%s2402_s1 + $0x3c8] sm:$0xff]   ;;  %v1932_v28 = vld [vmem:[%s2402_s1 + $0x340] sm:$0xff]   ;;  %v362_v32 = vrot.slane %v2275_v52, %v2086_v41 }
  0x78   :  { %1772 = vmatpush3.bf16.msra.mxu0 %v1926_v23  ;;  %v1930_v27 = vld [vmem:[%s2402_s1 + $0x308] sm:$0xff]   ;;  %v1933_v30 = vld [vmem:[%s2402_s1 + $0x3c0] sm:$0xff]  }
  0x79   :  { %1773 = vmatprep.subr.bf16.mxu0 %v1928_v24  ;;  %v1931_v29 = vld [vmem:[%s2402_s1 + $0x388] sm:$0xff]   ;;  %v1934_v31 = vld [vmem:[%s2402_s1 + $0x300] sm:$0xff]   ;;  %v378_v34 = vcombine.high %v362_v32, %v362_v32 }
  0x7a   :  { %1794 = vmatpush3.bf16.msra.mxu1 %v1927_v25  ;;  %v1935_v33 = vld [vmem:[%s2402_s1 + $0x380] sm:$0xff]   ;;  %s1960_s1 = smov [#allocation2]  }
  0x7b   :  { %1795 = vmatprep.subr.bf16.mxu1 %v1929_v26  ;;  %v1500_v37 = vld [vmem:[%s2403_s2] ss:$0 sm:$0xff]  ;;  %s1492_s2 = sshll.u32 %s1960_s1, 4  ;;  %s1493_s2 = int_to_ptr.vmem [resolvable:$true] %s1492_s2 }
  0x7c   :  { %1774 = vmatpush3.bf16.msra.mxu0 %v1930_v27  ;;  %s1937_s28 = scalar_lea.vmem %s1493_s2, 32  ;;  %p1942_p1 = scmp.lt.s32.totalorder %s1493_s2, %s1493_s2 }
  0x7d   :  { %1775 = vmatprep.subr.bf16.mxu0 %v1932_v28  ;;  %p1938_p0 = scmp.ne.s32.totalorder %s1493_s2, %s1937_s28  ;;  %p1943_p2 = scmp.lt.s32.totalorder %s1937_s28, %s1937_s28 }
  0x7e   :  { %1796 = vmatpush3.bf16.msra.mxu1 %v1931_v29 }
  0x7f   :  { %1797 = vmatprep.subr.bf16.mxu1 %v1933_v30  ;;  %p1944_p3 = por %p1943_p2, %p1942_p1 }
  0x80   :  { %1776 = vmatpush3.bf16.msra.mxu0 %v1934_v31 }
  0x81   :  { %p1945_p4 = pnand %p1944_p3, %p1938_p0 }
  0x82   :  { %1798 = vmatpush3.bf16.msra.mxu1 %v1935_v33 }
  0x83   :  { %1438 = vmatmul.mubr.bf16.vlgmr.msra.gmra.mxu0 %v362_v32 }
  0x85   :  { %1478 = vmatmul.mubr.bf16.vlgmr.msra.gmra.mxu1 %v378_v34 }
  0xe3   :  { %v1645_v35 = vpop.f32.mrf.mxu0 }
  0xe4   :  { %v1667_v36 = vpop.f32.mrf.mxu1 }
  0xe5   :  { %v1646_v38 = vpop.f32.mrf.mxu0 }
  0xe6   :  { %v1647_v39 = vadd.f32 %v1646_v38, %v1645_v35  ;;  %v1668_v41 = vpop.f32.mrf.mxu1 }
  0xe7   :  { %v1648_v40 = vpop.f32.mrf.mxu0  ;;  %v1669_v43 = vadd.f32 %v1668_v41, %v1667_v36 }
  0xe8   :  { %v1200_v42 = vadd.f32 %v1647_v39, %v1500_v37  ;;  %v1670_v44 = vpop.f32.mrf.mxu1 }
  0xe9   :  { %v1649_v45 = vpop.f32.mrf.mxu0 }
  0xea   :  { %v1240_v46 = vadd.f32 %v1669_v43, %v1200_v42  ;;  %v1671_v47 = vpop.f32.mrf.mxu1 }
 0x103   :  { %v1689_v48 = vpop.f32.mrf.mxu0 }
 0x104   :  { %v1711_v49 = vpop.f32.mrf.mxu1 }
 0x105   :  { %v1690_v50 = vpop.f32.mrf.mxu0 }
 0x106   :  { %v1712_v51 = vpop.f32.mrf.mxu1  ;;  %v1691_v0 = vadd.f32 %v1690_v50, %v1689_v48 }
 0x107   :  { %v1692_v52 = vpop.f32.mrf.mxu0  ;;  %v1713_v2 = vadd.f32 %v1712_v51, %v1711_v49 }
 0x108   :  { %v1714_v53 = vpop.f32.mrf.mxu1  ;;  %v1280_v1 = vadd.f32 %v1691_v0, %v1240_v46 }
 0x109   :  { %v1693_v54 = vpop.f32.mrf.mxu0 }
 0x10a   :  { %v1715_v55 = vpop.f32.mrf.mxu1  ;;  %v1320_v4 = vadd.f32 %v1713_v2, %v1280_v1 }
 0x123   :  { %v1733_v56 = vpop.f32.mrf.mxu0 }
 0x125   :  { %v1755_v57 = vpop.f32.mrf.mxu1  ;;  %v1734_v58 = vpop.f32.mrf.mxu0 }
 0x126   :  { %v1735_v3 = vadd.f32 %v1734_v58, %v1733_v56 }
 0x127   :  { %v1756_v59 = vpop.f32.mrf.mxu1  ;;  %v1736_v60 = vpop.f32.mrf.mxu0 }
 0x128   :  { %v1360_v5 = vadd.f32 %v1735_v3, %v1320_v4  ;;  %v1757_v6 = vadd.f32 %v1756_v59, %v1755_v57 }
 0x129   :  { %v1758_v61 = vpop.f32.mrf.mxu1  ;;  %v1737_v62 = vpop.f32.mrf.mxu0 }
 0x12a   :  { %v1400_v10 = vadd.f32 %v1757_v6, %v1360_v5 }
 0x12b   :  { %v1759_v63 = vpop.f32.mrf.mxu1 }
 0x143   :  { %v1777_v7 = vpop.f32.mrf.mxu0 }
 0x145   :  { %v1799_v8 = vpop.f32.mrf.mxu1  ;;  %v1778_v9 = vpop.f32.mrf.mxu0 }
 0x146   :  { %v1779_v11 = vadd.f32 %v1778_v9, %v1777_v7 }
 0x147   :  { %v1800_v12 = vpop.f32.mrf.mxu1  ;;  %v1780_v13 = vpop.f32.mrf.mxu0 }
 0x148   :  { %v1440_v14 = vadd.f32 %v1779_v11, %v1400_v10  ;;  %v1801_v15 = vadd.f32 %v1800_v12, %v1799_v8 }
 0x149   :  { %v1802_v16 = vpop.f32.mrf.mxu1  ;;  %v1781_v17 = vpop.f32.mrf.mxu0 }
 0x14a   :  { %v1480_v18 = vadd.f32 %v1801_v15, %v1440_v14 }
 0x14b   :  { %v1803_v19 = vpop.f32.mrf.mxu1 }
 0x14c   :  { %1485 = vst [vmem:[#allocation2] sm:$0x3] %v1480_v18 }
 0x14d   :  { %1948 = shalt.err (!%p1945_p4)
}
 0x14e   :  { %1495 = dma.vmem_to_hbm [thread:$0]  %s1493_s2, 32, %s2404_s3, [#allocation3]  }
 0x14f   :  { %1957 = dma.done.wait [#allocation3], 32  }
 0x150   :  { %1958 = vsyncadd [#allocation3], 4294967264 }
 0x151   :  { %1499 = vsyncpa [#allocation3], 1 }

</bundles_post_ra>
